<compile_context>
chip_gen: v5e
topology: v5e:2x2
jax: 0.10.0
libtpu: 0.0.40
codegen_flags: <defaults>
</compile_context>

<pallas_src>
import functools

import jax
import jax.numpy as jnp
from jax.experimental import pallas as pl
from jax.experimental.pallas import tpu as pltpu

N_FEATURES = 300
IN_DIM = 1 + N_FEATURES  # len(['investment_id'] + [f'f_{i}' ...]) == 301
DIMS = [IN_DIM, 64, 128, 32, 1]

# Default tile; sweep 4096-8192 per generation.  At 4096 the working set is
# ~19 MiB (x f32 tile x2 buffers + f32 intermediates), well under v7x's 64 MiB
# physical VMEM and the 48 MiB limit requested below.
DEFAULT_BATCH_TILE = 4096


def _round_up(x, m):
    return ((x + m - 1) // m) * m


def _mlp_kernel(x_ref,
                w1_ref, b1_ref,
                w2_ref, b2_ref,
                w3_ref, b3_ref,
                w4_ref, b4_ref,
                o_ref):
    """Fused 4-layer MLP with ReLU between layers (dropout = identity).

    x arrives in f32 and is cast to bf16 on the VPU (hidden under the x DMA);
    matmuls accumulate in f32.  The final (N=1) layer is computed transposed
    (w4 @ h^T) so the per-tile output is a lane-dense (1, tile) row.
    """
    x = x_ref[...]                        # (tile, 301) f32 (native dtype)
    x_bf = x.astype(jnp.bfloat16)         # in-kernel cast (VPU), no wrapper HBM pass

    w1 = w1_ref[...]                      # (301, 64) bf16
    h = jnp.dot(x_bf, w1, preferred_element_type=jnp.float32)
    # Exact-f32 correction for column 0 (investment_id): large integer ids
    # would otherwise be rounded by the bf16 cast.  Cheap VPU outer product.
    x0_err = x[:, 0:1] - x_bf[:, 0:1].astype(jnp.float32)           # (tile, 1)
    h = h + x0_err * w1[0:1, :].astype(jnp.float32) + b1_ref[...]
    h = jnp.maximum(h, 0.0)               # ReLU (Dropout -> identity)

    h = jnp.dot(h.astype(jnp.bfloat16), w2_ref[...],
                preferred_element_type=jnp.float32) + b2_ref[...]
    h = jnp.maximum(h, 0.0)

    h = jnp.dot(h.astype(jnp.bfloat16), w3_ref[...],
                preferred_element_type=jnp.float32) + b3_ref[...]
    h = jnp.maximum(h, 0.0)               # (tile, 32) f32

    # Final layer, lane-dense: rows = w4_pad (8,32) contracted with h (tile,32)
    # over k -> (8, tile) on the MXU (w4 zero-padded to a full sublane tile;
    # row 0 holds the real weight).  Emitting a (1, tile) row gives full-width
    # stores instead of tile/8 masked single-lane stores.
    rows = jnp.einsum("rk,nk->rn", w4_ref[...], h,
                      preferred_element_type=jnp.float32)            # (8, tile)
    row = rows[0:1, :] + b4_ref[0]                                   # (1, tile)
    o_ref[...] = row.reshape(o_ref.shape).astype(o_ref.dtype)


def _full_spec(arr):
    # Grid-invariant (weights/biases): same block every step -> DMA'd once.
    return pl.BlockSpec(arr.shape, lambda i: (0,) * arr.ndim)


@functools.partial(jax.jit, static_argnames=("batch_tile",))
def ubiquant_forward(x, params, batch_tile=None):
    """x: (B, 301) float32.  params: dict of w1..w4, b1..b4.  Returns (B, 1) f32."""
    B = x.shape[0]
    assert x.shape[1] == IN_DIM

    if batch_tile is None:
        # Prefer >= 2 grid steps (keeps both v7x TensorCores busy) while keeping
        # tiles large enough to amortize the ~0.35us per-step pipeline overhead.
        cand = _round_up(max((B + 1) // 2, 1), 128)
        batch_tile = max(128, min(DEFAULT_BATCH_TILE, cand))
    batch_tile = max(128, _round_up(int(batch_tile), 128))   # lane/sublane aligned

    n_tiles = pl.cdiv(B, batch_tile)

    # Weights are tiny; casting/padding them in the wrapper is negligible HBM.
    w1 = params["w1"].astype(jnp.bfloat16)                    # (301, 64)
    w2 = params["w2"].astype(jnp.bfloat16)                    # (64, 128)
    w3 = params["w3"].astype(jnp.bfloat16)                    # (128, 32)
    w4 = params["w4"].reshape(1, DIMS[3]).astype(jnp.float32)
    w4_pad = jnp.zeros((8, DIMS[3]), jnp.float32).at[0:1, :].set(w4)
    b1 = params["b1"].reshape(1, -1).astype(jnp.float32)
    b2 = params["b2"].reshape(1, -1).astype(jnp.float32)
    b3 = params["b3"].reshape(1, -1).astype(jnp.float32)
    b4 = params["b4"].reshape(-1).astype(jnp.float32)         # (1,) scalar -> SMEM

    grid_spec = pltpu.PrefetchScalarGridSpec(
        num_scalar_prefetch=0,
        grid=(n_tiles,),
        in_specs=[
            # x read in native dtype; the last block may be partial (rows >= B
            # are unspecified garbage, confined to their own output lanes and
            # sliced off below).  301 == full array dim, so lanes are legal.
            pl.BlockSpec((batch_tile, IN_DIM), lambda i: (i, 0)),
            _full_spec(w1), _full_spec(b1),
            _full_spec(w2), _full_spec(b2),
            _full_spec(w3), _full_spec(b3),
            _full_spec(w4_pad),
            pl.BlockSpec(memory_space=pltpu.MemorySpace.SMEM),   # b4 scalar
        ],
        # Lane-dense output: one (1, batch_tile) row per grid step.
        out_specs=pl.BlockSpec((1, 1, batch_tile), lambda i: (i, 0, 0)),
    )

    out = pl.pallas_call(
        _mlp_kernel,
        out_shape=jax.ShapeDtypeStruct((n_tiles, 1, batch_tile), jnp.float32),
        grid_spec=grid_spec,
        compiler_params=pltpu.CompilerParams(
            dimension_semantics=("parallel",),        # megacore sharding on v7x
            vmem_limit_bytes=48 * 1024 * 1024,        # fits tile<=4096 on every gen
        ),
    )(x, w1, b1, w2, b2, w3, b3, w4_pad, b4)

    # (n_tiles, 1, batch_tile) -> flat padded rows -> drop ragged tail -> (B, 1).
    return out.reshape(-1)[:B].reshape(B, 1)


def init_params(key):
    """Deterministic init mimicking nn.Linear default (uniform +-1/sqrt(fan_in)).
    Weights stored as (in, out); biases as (1, out)."""
    params = {}
    for li in range(4):
        fan_in, fan_out = DIMS[li], DIMS[li + 1]
        key, kw, kb = jax.random.split(key, 3)
        bound = 1.0 / (fan_in ** 0.5)
        params[f"w{li+1}"] = jax.random.uniform(
            kw, (fan_in, fan_out), jnp.float32, -bound, bound)
        params[f"b{li+1}"] = jax.random.uniform(
            kb, (1, fan_out), jnp.float32, -bound, bound)
    return params


def reference_forward(x, params):
    """Pure-JAX f32 reference (eval-mode dropout = identity)."""
    h = x
    for li in range(1, 5):
        h = h @ params[f"w{li}"] + params[f"b{li}"]
        if li < 4:
            h = jnp.maximum(h, 0.0)
    return h


if __name__ == "__main__":
    key = jax.random.PRNGKey(0)
    key, kx = jax.random.split(key)

    # Small demo batch; batch_tile=128 exercises a multi-step pipelined grid
    # and the ragged last block (300 rows -> 2 full tiles + 44-row partial).
    B = 300
    x = jax.random.normal(kx, (B, IN_DIM), dtype=jnp.float32)
    params = init_params(key)

    out = ubiquant_forward(x, params, batch_tile=128)
    out = jax.block_until_ready(out)

    ref = reference_forward(x, params)
    assert out.shape == (B, 1)
    # bf16 weight/activation operands (f32 accumulation) -> loose tolerance.
    assert jnp.allclose(out, ref, atol=2e-2, rtol=2e-2), "mismatch vs reference"

    print("KERNEL_OK")
</pallas_src>

<mosaic_0001>
module attributes {stable_mosaic.version = 11 : i64} {
  func.func @_mlp_kernel(%arg0: i32, %arg1: memref<128x301xf32, #tpu.memory_space<vmem>>, %arg2: memref<301x64xbf16, #tpu.memory_space<vmem>>, %arg3: memref<1x64xf32, #tpu.memory_space<vmem>>, %arg4: memref<64x128xbf16, #tpu.memory_space<vmem>>, %arg5: memref<1x128xf32, #tpu.memory_space<vmem>>, %arg6: memref<128x32xbf16, #tpu.memory_space<vmem>>, %arg7: memref<1x32xf32, #tpu.memory_space<vmem>>, %arg8: memref<8x32xf32, #tpu.memory_space<vmem>>, %arg9: memref<1xf32, #tpu.memory_space<smem>>, %arg10: memref<1x1x128xf32, #tpu.memory_space<vmem>>) attributes {dimension_semantics = [#tpu.dimension_semantics<parallel>], iteration_bounds = array<i64: 3>, scalar_prefetch = 0 : i64, scratch_operands = 0 : i64, tpu.core_type = #tpu.core_type<tc>, window_params = [{transform_indices = @transform_0, window_bounds = array<i64: 128, 301>}, {pipeline_mode = #tpu.pipeline_mode<synchronous>, transform_indices = @transform_1, window_bounds = array<i64: 301, 64>}, {pipeline_mode = #tpu.pipeline_mode<synchronous>, transform_indices = @transform_2, window_bounds = array<i64: 1, 64>}, {pipeline_mode = #tpu.pipeline_mode<synchronous>, transform_indices = @transform_3, window_bounds = array<i64: 64, 128>}, {pipeline_mode = #tpu.pipeline_mode<synchronous>, transform_indices = @transform_4, window_bounds = array<i64: 1, 128>}, {pipeline_mode = #tpu.pipeline_mode<synchronous>, transform_indices = @transform_5, window_bounds = array<i64: 128, 32>}, {pipeline_mode = #tpu.pipeline_mode<synchronous>, transform_indices = @transform_6, window_bounds = array<i64: 1, 32>}, {pipeline_mode = #tpu.pipeline_mode<synchronous>, transform_indices = @transform_7, window_bounds = array<i64: 8, 32>}, {transform_indices = @transform_8, window_bounds = array<i64: 1>}, {transform_indices = @transform_9, window_bounds = array<i64: 1, 1, 128>}]} {
    %c0 = arith.constant 0 : index
    %c0_0 = arith.constant 0 : index
    %0 = vector.load %arg1[%c0, %c0_0] : memref<128x301xf32, #tpu.memory_space<vmem>>, vector<128x301xf32>
    %1 = arith.truncf %0 : vector<128x301xf32> to vector<128x301xbf16>
    %c0_1 = arith.constant 0 : index
    %c0_2 = arith.constant 0 : index
    %2 = vector.load %arg2[%c0_1, %c0_2] : memref<301x64xbf16, #tpu.memory_space<vmem>>, vector<301x64xbf16>
    %cst = arith.constant dense<0.000000e+00> : vector<128x64xf32>
    %3 = tpu.matmul %1, %2, %cst {dimension_numbers = #tpu.dot_dimension_numbers<[1], [0], [0], [1], [0, 0, 1, 1], [], []>} : vector<128x301xbf16>, vector<301x64xbf16>, vector<128x64xf32> -> vector<128x64xf32>
    %4 = vector.extract_strided_slice %0 {offsets = [0, 0], sizes = [128, 1], strides = [1, 1]} : vector<128x301xf32> to vector<128x1xf32>
    %5 = vector.extract_strided_slice %1 {offsets = [0, 0], sizes = [128, 1], strides = [1, 1]} : vector<128x301xbf16> to vector<128x1xbf16>
    %6 = arith.extf %5 : vector<128x1xbf16> to vector<128x1xf32>
    %7 = arith.subf %4, %6 : vector<128x1xf32>
    %8 = vector.extract_strided_slice %2 {offsets = [0, 0], sizes = [1, 64], strides = [1, 1]} : vector<301x64xbf16> to vector<1x64xbf16>
    %9 = arith.extf %8 : vector<1x64xbf16> to vector<1x64xf32>
    %10 = vector.broadcast %7 : vector<128x1xf32> to vector<128x64xf32>
    %11 = vector.broadcast %9 : vector<1x64xf32> to vector<128x64xf32>
    %12 = arith.mulf %10, %11 : vector<128x64xf32>
    %13 = arith.addf %3, %12 : vector<128x64xf32>
    %c0_3 = arith.constant 0 : index
    %c0_4 = arith.constant 0 : index
    %14 = vector.load %arg3[%c0_3, %c0_4] : memref<1x64xf32, #tpu.memory_space<vmem>>, vector<1x64xf32>
    %15 = vector.broadcast %14 : vector<1x64xf32> to vector<128x64xf32>
    %16 = arith.addf %13, %15 : vector<128x64xf32>
    %cst_5 = arith.constant 0.000000e+00 : f32
    %17 = vector.broadcast %cst_5 : f32 to vector<128x64xf32>
    %18 = arith.maximumf %16, %17 : vector<128x64xf32>
    %19 = arith.truncf %18 : vector<128x64xf32> to vector<128x64xbf16>
    %c0_6 = arith.constant 0 : index
    %c0_7 = arith.constant 0 : index
    %20 = vector.load %arg4[%c0_6, %c0_7] : memref<64x128xbf16, #tpu.memory_space<vmem>>, vector<64x128xbf16>
    %cst_8 = arith.constant dense<0.000000e+00> : vector<128x128xf32>
    %21 = tpu.matmul %19, %20, %cst_8 {dimension_numbers = #tpu.dot_dimension_numbers<[1], [0], [0], [1], [0, 0, 1, 1], [], []>} : vector<128x64xbf16>, vector<64x128xbf16>, vector<128x128xf32> -> vector<128x128xf32>
    %c0_9 = arith.constant 0 : index
    %c0_10 = arith.constant 0 : index
    %22 = vector.load %arg5[%c0_9, %c0_10] : memref<1x128xf32, #tpu.memory_space<vmem>>, vector<1x128xf32>
    %23 = vector.broadcast %22 : vector<1x128xf32> to vector<128x128xf32>
    %24 = arith.addf %21, %23 : vector<128x128xf32>
    %cst_11 = arith.constant 0.000000e+00 : f32
    %25 = vector.broadcast %cst_11 : f32 to vector<128x128xf32>
    %26 = arith.maximumf %24, %25 : vector<128x128xf32>
    %27 = arith.truncf %26 : vector<128x128xf32> to vector<128x128xbf16>
    %c0_12 = arith.constant 0 : index
    %c0_13 = arith.constant 0 : index
    %28 = vector.load %arg6[%c0_12, %c0_13] : memref<128x32xbf16, #tpu.memory_space<vmem>>, vector<128x32xbf16>
    %cst_14 = arith.constant dense<0.000000e+00> : vector<128x32xf32>
    %29 = tpu.matmul %27, %28, %cst_14 {dimension_numbers = #tpu.dot_dimension_numbers<[1], [0], [0], [1], [0, 0, 1, 1], [], []>} : vector<128x128xbf16>, vector<128x32xbf16>, vector<128x32xf32> -> vector<128x32xf32>
    %c0_15 = arith.constant 0 : index
    %c0_16 = arith.constant 0 : index
    %30 = vector.load %arg7[%c0_15, %c0_16] : memref<1x32xf32, #tpu.memory_space<vmem>>, vector<1x32xf32>
    %31 = vector.broadcast %30 : vector<1x32xf32> to vector<128x32xf32>
    %32 = arith.addf %29, %31 : vector<128x32xf32>
    %cst_17 = arith.constant 0.000000e+00 : f32
    %33 = vector.broadcast %cst_17 : f32 to vector<128x32xf32>
    %34 = arith.maximumf %32, %33 : vector<128x32xf32>
    %c0_18 = arith.constant 0 : index
    %c0_19 = arith.constant 0 : index
    %35 = vector.load %arg8[%c0_18, %c0_19] : memref<8x32xf32, #tpu.memory_space<vmem>>, vector<8x32xf32>
    "tpu.trace_start"() <{level = 10 : i32, message = "rk,nk->rn"}> : () -> ()
    %cst_20 = arith.constant dense<0.000000e+00> : vector<8x128xf32>
    %36 = tpu.matmul %35, %34, %cst_20 {dimension_numbers = #tpu.dot_dimension_numbers<[1], [1], [0], [0], [0, 0, 1, 0], [], []>} : vector<8x32xf32>, vector<128x32xf32>, vector<8x128xf32> -> vector<8x128xf32>
    "tpu.trace_stop"() : () -> ()
    %37 = vector.extract_strided_slice %36 {offsets = [0, 0], sizes = [1, 128], strides = [1, 1]} : vector<8x128xf32> to vector<1x128xf32>
    %c0_21 = arith.constant 0 : index
    %38 = memref.load %arg9[%c0_21] : memref<1xf32, #tpu.memory_space<smem>>
    %39 = vector.broadcast %38 : f32 to vector<1x128xf32>
    %40 = arith.addf %37, %39 : vector<1x128xf32>
    %41 = vector.shape_cast %40 : vector<1x128xf32> to vector<1x1x128xf32>
    %c0_22 = arith.constant 0 : index
    %c0_23 = arith.constant 0 : index
    %c0_24 = arith.constant 0 : index
    %42 = vector.load %arg10[%c0_22, %c0_23, %c0_24] : memref<1x1x128xf32, #tpu.memory_space<vmem>>, vector<1x1x128xf32>
    tpu.vector_store %arg10[%c0_22, %c0_23, %c0_24], %41 {strides = array<i32>} : memref<1x1x128xf32, #tpu.memory_space<vmem>>, vector<1x1x128xf32>,
    return
  }
  func.func @transform_0(%arg0: i32) -> (i32, i32) {
    %c0_i32 = arith.constant 0 : i32
    %c0_i32_0 = arith.constant 0 : i32
    return %arg0, %c0_i32 : i32, i32
  }
  func.func @transform_1(%arg0: i32) -> (i32, i32) {
    %c0_i32 = arith.constant 0 : i32
    %c0_i32_0 = arith.constant 0 : i32
    %c0_i32_1 = arith.constant 0 : i32
    return %c0_i32, %c0_i32_0 : i32, i32
  }
  func.func @transform_2(%arg0: i32) -> (i32, i32) {
    %c0_i32 = arith.constant 0 : i32
    %c0_i32_0 = arith.constant 0 : i32
    %c0_i32_1 = arith.constant 0 : i32
    return %c0_i32, %c0_i32_0 : i32, i32
  }
  func.func @transform_3(%arg0: i32) -> (i32, i32) {
    %c0_i32 = arith.constant 0 : i32
    %c0_i32_0 = arith.constant 0 : i32
    %c0_i32_1 = arith.constant 0 : i32
    return %c0_i32, %c0_i32_0 : i32, i32
  }
  func.func @transform_4(%arg0: i32) -> (i32, i32) {
    %c0_i32 = arith.constant 0 : i32
    %c0_i32_0 = arith.constant 0 : i32
    %c0_i32_1 = arith.constant 0 : i32
    return %c0_i32, %c0_i32_0 : i32, i32
  }
  func.func @transform_5(%arg0: i32) -> (i32, i32) {
    %c0_i32 = arith.constant 0 : i32
    %c0_i32_0 = arith.constant 0 : i32
    %c0_i32_1 = arith.constant 0 : i32
    return %c0_i32, %c0_i32_0 : i32, i32
  }
  func.func @transform_6(%arg0: i32) -> (i32, i32) {
    %c0_i32 = arith.constant 0 : i32
    %c0_i32_0 = arith.constant 0 : i32
    %c0_i32_1 = arith.constant 0 : i32
    return %c0_i32, %c0_i32_0 : i32, i32
  }
  func.func @transform_7(%arg0: i32) -> (i32, i32) {
    %c0_i32 = arith.constant 0 : i32
    %c0_i32_0 = arith.constant 0 : i32
    %c0_i32_1 = arith.constant 0 : i32
    return %c0_i32, %c0_i32_0 : i32, i32
  }
  func.func @transform_8(%arg0: i32) -> i32 {
    %c0_i32 = arith.constant 0 : i32
    %c0_i32_0 = arith.constant 0 : i32
    return %c0_i32 : i32
  }
  func.func @transform_9(%arg0: i32) -> (i32, i32, i32) {
    %c0_i32 = arith.constant 0 : i32
    %c0_i32_0 = arith.constant 0 : i32
    %c0_i32_1 = arith.constant 0 : i32
    return %arg0, %c0_i32, %c0_i32_0 : i32, i32, i32
  }
}

</mosaic_0001>

<bundles_post_ra>
// kernel: ubiquant_forward.1
= control target key start
LH: loop header
LB: loop body
LE: loop exit
PB: predicated region body
PF: predicated region fallthrough
CT: control target
= control target key end

     0   :  { %s2256_s0 = inlined_call_operand.hbm [shape: f32[300,301], index: 0, kind: input, shape index: {}]   ;;  %s2257_s1 = inlined_call_operand.vmem [shape: bf16[301,64], index: 1, kind: input, shape index: {}]   ;;  %s2258_s2 = inlined_call_operand.vmem [shape: f32[1,64], index: 2, kind: input, shape index: {}]   ;;  %s2259_s3 = inlined_call_operand.vmem [shape: bf16[64,128], index: 3, kind: input, shape index: {}]   ;;  %s2260_s4 = inlined_call_operand.vmem [shape: f32[1,128], index: 4, kind: input, shape index: {}]   ;;  %s2261_s5 = inlined_call_operand.vmem [shape: bf16[128,32], index: 5, kind: input, shape index: {}]   ;;  %s2262_s6 = inlined_call_operand.vmem [shape: f32[1,32], index: 6, kind: input, shape index: {}]   ;;  %s2263_s7 = inlined_call_operand.vmem [shape: f32[8,32], index: 7, kind: input, shape index: {}]   ;;  %s2264_s8 = inlined_call_operand.<no memory space> [shape: f32[1], index: 8, kind: input, shape index: {}]   ;;  %s2265_s9 = inlined_call_operand.vmem [shape: f32[3,1,128], index: 9, kind: output, shape index: {}]  }
   0x1   :  { %14 = sst [smem:[#allocation2]] %s2264_s8 }
   0x2   :  { %15 = vsyncpa [#allocation4], 0 }
   0x3   :  { %17 = vsyncpa [#allocation4 + $0x1], 0  ;;  %s1861_s11 = smov 0   ;;  %s1863_s12 = smov 0  }
   0x4   :  { %s1865_s13 = smov 0   ;;  %s1867_s14 = smov 0  }
   0x5 LB: > { %s1880_s8 = sadd.s32 4294967295, %s1801_s14   ;;  %s1883_s15 = sadd.s32 1, %s1801_s14   ;;  %s1801_s14 = sphi %s1867_s14, %s2271_s14   ;;  %s1797_s13 = sphi %s1865_s13, %s2270_s13   ;;  %s1793_s12 = sphi %s1863_s12, %s2269_s12   ;;  %s1789_s11 = sphi %s1861_s11, %s2268_s11  }
   0x6   : > { %s27_s16 = ssub.s32 %s1801_s14, %s1883_s15  ;;  %s30_s17 = sadd.s32 1, %s1797_s13 }
   0x7   : > { %p28_p0 = scmp.eq.s32.totalorder %s27_s16, 0  ;;  %p37_p1 = scmp.ne.s32.totalorder %s1797_s13, %s1793_s12 }
   0x8   : > { %p38_p2 = scmp.eq.s32.totalorder %s1801_s14, 0  ;;  %p43_p3 = scmp.ne.s32.totalorder %s1793_s12, %s1789_s11 }
   0x9   : > { %s1893_s18 = scalar_select %p28_p0, %s1797_s13, %s30_s17  }
   0xa   : > { %p39_p4 = por %p38_p2, %p37_p1  ;;  %p44_p5 = scmp.eq.s32.totalorder %s1880_s8, 0 }
   0xb   : > { %p1477_p7 = scmp.ge.s32.totalorder %s1801_s14, 3 }
   0xc   : > { %p1896_p6 = por %p44_p5, %p43_p3 }
   0xd   : > { %281 = sbr.rel (%p1477_p7) target bundleno = 59 (0x3b), region = 48 }
  0x12   : > { %284 = sbr.rel (!%p39_p4) target bundleno = 59 (0x3b), region = 52  ;;  %s285_s20 = sand.u32 (%p39_p4), 1, %s1797_s13  }
  0x13   : > { %s1478_s21 = sshll.u32 (%p39_p4), %s1801_s14, 4  ;;  %s1682_s22 = smul.u32 (%p39_p4), 384, %s285_s20 }
  0x14   : > { %s291_s23 = ssub.s32 (%p39_p4), 38, %s1478_s21  ;;  %s1903_s27 = scalar_lea.sflag (%p39_p4), [#allocation4], %s285_s20 }
  0x15   : > { %p292_p8 = scmp.lt.s32.totalorder (%p39_p4), %s291_s23, 16  ;;  %s289_s28 = scalar_lea.vmem (%p39_p4), [#allocation3], %s1682_s22 }
  0x17   : > { %s2273_s23 = smov (!%p292_p8, %s291_s23), 16 }
  0x18   : > { %s1480_s24 = smul.u32 24, %s2273_s23 }
  0x1a   : > { %s296_s25 = ssub.s32 384, %s1480_s24 }
  0x1b   : > { %s297_s26 = sshll.u32 %s296_s25, 4 }
  0x1c   : > { %298 = vsyncadd %s1903_s27, %s297_s26  ;;  %p1906_p9 = scmp.ne.s32.totalorder %s1480_s24, 0  ;;  %s1683_s30 = smul.u32 384, %s1801_s14 }
  0x1d   : > { %s1911_s10 = sshll.u32 %s289_s28, 4  ;;  %s1913_s11 = smul.u32 384, %s2273_s23  ;;  %s307_s10 = int_to_ptr.vmem [resolvable:$true] %s1911_s10 }
  0x1e   : > { %s302_s20 = scalar_lea.hbm %s2256_s0, %s1683_s30  ;;  %s1739_s30 = scalar_lea.hbm %s2256_s0, 912 }
  0x1f   : > { %s304_s21 = sshll.u32 %s302_s20, 4  ;;  %s1730_s24 = sshrl.u32 %s1913_s11, 4  ;;  %s1919_s21 = int_to_ptr.hbm [resolvable:$true] %s304_s21 }
  0x20   : > { %s1728_s22 = sshra.s32 %s1919_s21, 4  ;;  %s1766_s25 = sshll.u32 %s1730_s24, 4  ;;  %s1729_s22 = int_to_ptr.hbm [resolvable:$true] %s1728_s22 }
  0x21   : > { %p1732_p10 = scmp.ne.s32.totalorder %s1766_s25, %s1913_s11  ;;  %s1733_s26 = sadd.s32 1, %s1730_s24 }
  0x22   : > { %p1740_p0 = scmp.lt.s32.totalorder %s1729_s22, %s2256_s0 }
  0x23   : > { %s2275_s26 = smov (!%p1732_p10, %s1733_s26), %s1730_s24 }
  0x24   : > { %s1735_s23 = scalar_lea.hbm %s1729_s22, %s2275_s26 }
  0x25   : > { %p1736_p11 = scmp.ne.s32.totalorder %s1729_s22, %s1735_s23  ;;  %p1741_p1 = scmp.lt.s32.totalorder %s1739_s30, %s1735_s23 }
  0x27   : > { %p1737_p12 = pnand %p1736_p11, %p1906_p9  ;;  %p1742_p2 = por %p1741_p1, %p1740_p0 }
  0x29   : > { %p1738_p13 = pneg %p1737_p12 }
  0x2b   : > { %p1743_p3 = pnand %p1742_p2, %p1738_p13 }
  0x2d   : > { %1746 = shalt.err (!%p1743_p3)
}
  0x2e   : > { %s1747_s24 = sshra.s32 %s307_s10, 4  ;;  %s1803_s28 = smov [#allocation3]   ;;  %s1748_s24 = int_to_ptr.vmem [resolvable:$true] %s1747_s24 }
  0x2f   : > { %s1754_s25 = scalar_lea.vmem %s1748_s24, %s2275_s26  ;;  %s1758_s16 = scalar_lea.vmem %s1803_s28, 768 }
  0x30   : > { %p1755_p4 = scmp.ne.s32.totalorder %s1748_s24, %s1754_s25  ;;  %p1760_p8 = scmp.lt.s32.totalorder %s1758_s16, %s1754_s25 }
  0x32   : > { %p1756_p5 = pnand %p1755_p4, %p1906_p9 }
  0x34   : > { %p1757_p7 = pneg %p1756_p5 }
  0x36   : > { %p1762_p10 = pnand %p1760_p8, %p1757_p7 }
  0x38   : > { %1765 = shalt.err (!%p1762_p10)
}
  0x39   : > { %s1804_s22 = smov 384   ;;  %s1805_s23 = smov 24  }
  0x3a   : > { %312 = dma.hbm_to_vmem [thread:$0]  (%p1906_p9), %s1919_s21, %s1913_s11, %s307_s10, %s1903_s27, %s1804_s22, %s1804_s22, %s1805_s23  }
  0x3b PF: > { %p1485_p11 = scmp.ge.s32.totalorder %s1801_s14, 1  ;;  %p314_p12 = scmp.lt.s32.totalorder %s1801_s14, 4 }
  0x3d   : > { %p315_p13 = pnand %p1485_p11, %p314_p12 }
  0x3e   : > { %s320_s26 = sand.u32 (!%p315_p13), 1, %s1793_s12  }
  0x3f   : > { %318 = sbr.rel (%p315_p13) target bundleno = 965 (0x3c5), region = 56  ;;  %s321_s17 = scalar_lea.sflag (!%p315_p13), [#allocation4], %s320_s26 }
  0x40   : > { %s1684_s30 = smul.u32 (!%p315_p13), 384, %s320_s26 }
  0x42   : > { %s1946_s20 = scalar_lea.vmem (!%p315_p13), [#allocation3], %s1684_s30 }
  0x44   : > { %1784 = dma.done.wait (%p1896_p6), %s321_s17, 6144  }
  0x45   : > { %1786 = vsyncadd (%p1896_p6), %s321_s17, 4294961152  ;;  %v1652_v0 = vld [vmem:[%s2257_s1 + $0x38] sm:$0xff]  ;;  %v1651_v2 = vld [vmem:[%s2257_s1 + $0x30] sm:$0xff]  ;;  %v1806_v4 = vmov 0   ;;  %vm874_vm0 = vcmask 1045504   ;;  %vm875_vm1 = vcmask 1046528  }
  0x46   : > { %v1660_v1 = vld [vmem:[%s2257_s1 + $0x78] sm:$0xff]  ;;  %881 = vmatpush.bf16.msra.mxu0 %v1652_v0  ;;  %v1659_v3 = vld [vmem:[%s2257_s1 + $0x70] sm:$0xff]  ;;  %1722 = vset.pattern.permute.xlu0 %v1806_v4  ;;  %v368_v5 = vld [vmem:[%s1946_s20] sm:$0xff]  ;;  %v1807_v27 = vmov 65535   ;;  %vm849_vm2 = vcmask 367616   ;;  %vm1108_vm3 = vcmask 523264  }
  0x47   : > { %930 = vmatpush.bf16.msra.mxu1 %v1660_v1  ;;  %1723 = vset.pattern.permute.xlu1 %v1806_v4  ;;  %v369_v6 = vld [vmem:[%s1946_s20 + $0x8] sm:$0xff]  ;;  %v371_v11 = vld [vmem:[%s1946_s20 + $0x18] sm:$0xff]  ;;  %v372_v12 = vld [vmem:[%s1946_s20 + $0x20] sm:$0xff]  ;;  %v876_v28 = vsel %vm874_vm0, 4294967295, %v1807_v27  ;;  %vm1340_vm4 = vcmask 261120   ;;  %s1412_s25 = sld [smem:[#allocation2]] }
  0x48   : > { %1724 = vset.pattern.permute.xlu2 %v1806_v4  ;;  %v1650_v7 = vld [vmem:[%s2257_s1 + $0x28] sm:$0xff]  ;;  %v1972_v9 = vpack.c.bf16 %v369_v6, %v368_v5  ;;  %v1649_v13 = vld [vmem:[%s2257_s1 + $0x20] sm:$0xff]  ;;  %v418_v16 = vpack.c.bf16 %v372_v12, %v371_v11  ;;  %v374_v17 = vld [vmem:[%s1946_s20 + $0x30] sm:$0xff]  ;;  %v877_v29 = vsel %vm875_vm1, %v876_v28, 0  ;;  %p364_p6 = scmp.lt.s32.totalorder %s1880_s8, 2 }
  0x49   : > { %v1658_v8 = vld [vmem:[%s2257_s1 + $0x68] sm:$0xff]  ;;  %v1657_v14 = vld [vmem:[%s2257_s1 + $0x60] sm:$0xff]  ;;  %v375_v18 = vld [vmem:[%s1946_s20 + $0x38] sm:$0xff] }
  0x4a   : > { %882 = vmatpush.bf16.msra.mxu0 %v1651_v2  ;;  %v486_v10 = vunpack.c.l.bf16 %v1972_v9  ;;  %v1648_v19 = vld [vmem:[%s2257_s1 + $0x18] sm:$0xff]  ;;  %v487_v21 = vunpack.c.l.bf16 %v418_v16  ;;  %v1991_v22 = vpack.c.bf16 %v375_v18, %v374_v17  ;;  %v1560_v23 = vld [vmem:[%s2257_s1 + $0x90] sm:$0xf]  ;;  %v1663_v24 = vld [vmem:[%s2257_s1 + $0x90] sm:$0x70]  ;;  %v648_v45 = vunpack.c.l.b16 %v1972_v9  ;;  %s2277_s8 = smov (!%p364_p6, %s1880_s8), 2 }
  0x4b   : > { %931 = vmatpush.bf16.msra.mxu1 %v1659_v3  ;;  %v1656_v20 = vld [vmem:[%s2257_s1 + $0x58] sm:$0xff]  ;;  %v1561_v26 = vor.u32 %v1663_v24, %v1560_v23  ;;  %v382_v31 = vld [vmem:[%s1946_s20 + $0x70] sm:$0xff]  ;;  %v385_v35 = vld [vmem:[%s1946_s20 + $0x88] sm:$0xff]  ;;  %v651_v46 = vunpack.c.l.b16 %v418_v16  ;;  %v649_v47 = vunpack.c.h.b16 %v1972_v9  ;;  %v652_v48 = vunpack.c.h.b16 %v418_v16  ;;  %s366_s16 = scalar_lea.vmem %s2265_s9, %s2277_s8 }
  0x4c   : > { %v502_v15 = vsub.f32 %v368_v5, %v486_v10  ;;  %v503_v25 = vsub.f32 %v371_v11, %v487_v21  ;;  %v488_v30 = vunpack.c.l.bf16 %v1991_v22  ;;  %v1647_v32 = vld [vmem:[%s2257_s1 + $0x10] sm:$0xff]  ;;  %v425_v37 = vpack.c.bf16 %v382_v31, %v382_v31  ;;  %v1662_v39 = vld [vmem:[%s2257_s1 + $0x88] sm:$0xff]  ;;  %v1661_v44 = vld [vmem:[%s2257_s1 + $0x80] sm:$0xff] }
  0x4d   : > { %v1655_v33 = vld [vmem:[%s2257_s1 + $0x50] sm:$0xff]  ;;  %v879_v34 = vand.u32 %v1561_v26, %v877_v29  ;;  %v427_v38 = vpack.c.bf16 %v385_v35, %v385_v35  ;;  %v1646_v40 = vld [vmem:[%s2257_s1 + $0x8] sm:$0xff]  ;;  %v1645_v51 = vld [vmem:[%s2257_s1] sm:$0xff]  ;;  %v696_v55 = vpack.c.b16 %v651_v46, %v648_v45  ;;  %v697_v56 = vpack.c.b16 %v652_v48, %v649_v47 }
  0x4e   : > { %883 = vmatpush.bf16.msra.mxu0 %v1650_v7  ;;  %521 = vperm.xlu0 %1722, %v502_v15   ;;  %v504_v36 = vsub.f32 %v374_v17, %v488_v30  ;;  %v1654_v41 = vld [vmem:[%s2257_s1 + $0x48] sm:$0xff]  ;;  %v662_v42 = vunpack.c.l.b16 %v425_v37  ;;  %v378_v50 = vld [vmem:[%s1946_s20 + $0x50] sm:$0xff]  ;;  %v1653_v52 = vld [vmem:[%s2257_s1 + $0x40] sm:$0xff]  ;;  %v654_v1 = vunpack.c.l.b16 %v1991_v22  ;;  %v655_v3 = vunpack.c.h.b16 %v1991_v22 }
  0x4f   : > { %932 = vmatpush.bf16.msra.mxu1 %v1658_v8  ;;  %1676 = vmatpush.bf16.msra.mxu2 %v879_v34  ;;  %v665_v43 = vunpack.c.l.b16 %v427_v38  ;;  %v377_v49 = vld [vmem:[%s1946_s20 + $0x48] sm:$0xff]  ;;  %v388_v59 = vld [vmem:[%s1946_s20 + $0xa0] sm:$0xff]  ;;  %v391_v60 = vld [vmem:[%s1946_s20 + $0xb8] sm:$0xff] }
  0x50   : > { %531 = vperm.xlu1 %1723, %v504_v36   ;;  %1677 = vmatpush.bf16.msra.mxu3 %v879_v34  ;;  %v422_v54 = vpack.c.bf16 %v378_v50, %v377_v49  ;;  %v429_v61 = vpack.c.bf16 %v388_v59, %v388_v59  ;;  %v431_v62 = vpack.c.bf16 %v391_v60, %v391_v60  ;;  %v386_v6 = vld [vmem:[%s1946_s20 + $0x90] sm:$0xff]  ;;  %v387_v7 = vld [vmem:[%s1946_s20 + $0x98] sm:$0xff]  ;;  %v380_v11 = vld [vmem:[%s1946_s20 + $0x60] sm:$0xff] }
  0x51   : > { %v704_v53 = vpack.c.b16 %v665_v43, %v662_v42  ;;  %v428_v10 = vpack.c.bf16 %v387_v7, %v386_v6  ;;  %v381_v15 = vld [vmem:[%s1946_s20 + $0x68] sm:$0xff]  ;;  %v383_v16 = vld [vmem:[%s1946_s20 + $0x78] sm:$0xff]  ;;  %v384_v17 = vld [vmem:[%s1946_s20 + $0x80] sm:$0xff] }
  0x52   : > { %884 = vmatpush.bf16.msra.mxu0 %v1649_v13  ;;  %v489_v57 = vunpack.c.l.bf16 %v422_v54  ;;  %v668_v63 = vunpack.c.l.b16 %v429_v61  ;;  %v671_v0 = vunpack.c.l.b16 %v431_v62  ;;  %v657_v2 = vunpack.c.l.b16 %v422_v54  ;;  %v394_v13 = vld [vmem:[%s1946_s20 + $0xd0] sm:$0xff]  ;;  %v389_v29 = vld [vmem:[%s1946_s20 + $0xa8] sm:$0xff] }
  0x53   : > { %933 = vmatpush.bf16.msra.mxu1 %v1657_v14  ;;  %1678 = vmatpush.bf16.msra.mxu2 %v1662_v39  ;;  %v658_v4 = vunpack.c.h.b16 %v422_v54  ;;  %v492_v12 = vunpack.c.l.bf16 %v428_v10  ;;  %v397_v14 = vld [vmem:[%s1946_s20 + $0xe8] sm:$0xff]  ;;  %v424_v21 = vpack.c.bf16 %v381_v15, %v380_v11  ;;  %v426_v22 = vpack.c.bf16 %v384_v17, %v383_v16  ;;  %v390_v30 = vld [vmem:[%s1946_s20 + $0xb0] sm:$0xff] }
  0x54   : > { %1679 = vmatpush.bf16.msra.mxu3 %v1662_v39  ;;  %v505_v58 = vsub.f32 %v377_v49, %v489_v57  ;;  %v707_v5 = vpack.c.b16 %v671_v0, %v668_v63  ;;  %v699_v8 = vpack.c.b16 %v657_v2, %v654_v1  ;;  %v666_v48 = vunpack.c.l.b16 %v428_v10  ;;  %v406_v63 = vld [vmem:[%s1946_s20 + $0x130] sm:$0xff]  ;;  %v409_v0 = vld [vmem:[%s1946_s20 + $0x148] sm:$0xff]  ;;  %v392_v1 = vld [vmem:[%s1946_s20 + $0xc0] sm:$0xff] }
  0x55   : > { %v700_v9 = vpack.c.b16 %v658_v4, %v655_v3  ;;  %v508_v18 = vsub.f32 %v386_v6, %v492_v12  ;;  %v663_v26 = vunpack.c.l.b16 %v426_v22  ;;  %v661_v27 = vunpack.c.h.b16 %v424_v21  ;;  %v393_v2 = vld [vmem:[%s1946_s20 + $0xc8] sm:$0xff] }
  0x56   : > { %885 = vmatpush.bf16.msra.mxu0 %v1648_v19  ;;  %526 = vperm.xlu0 %1722, %v503_v25   ;;  %v433_v19 = vpack.c.bf16 %v394_v13, %v394_v13  ;;  %v660_v25 = vunpack.c.l.b16 %v424_v21  ;;  %v664_v28 = vunpack.c.h.b16 %v426_v22  ;;  %v490_v35 = vunpack.c.l.bf16 %v424_v21  ;;  %v405_v15 = vld [vmem:[%s1946_s20 + $0x128] sm:$0xff] }
  0x57   : > { %934 = vmatpush.bf16.msra.mxu1 %v1656_v20  ;;  %1680 = vmatpush.bf16.msra.mxu2 %v1661_v44  ;;  %v435_v20 = vpack.c.bf16 %v397_v14, %v397_v14  ;;  %v667_v50 = vunpack.c.h.b16 %v428_v10  ;;  %v441_v3 = vpack.c.bf16 %v406_v63, %v406_v63  ;;  %v443_v4 = vpack.c.bf16 %v409_v0, %v409_v0  ;;  %v404_v14 = vld [vmem:[%s1946_s20 + $0x120] sm:$0xff] }
  0x58   : > { %1681 = vmatpush.bf16.msra.mxu3 %v1661_v44  ;;  %536 = vperm.xlu1 %1723, %v505_v58   ;;  %v674_v23 = vunpack.c.l.b16 %v433_v19  ;;  %v506_v37 = vsub.f32 %v380_v11, %v490_v35  ;;  %v440_v19 = vpack.c.bf16 %v405_v15, %v404_v14 }
  0x59   : > { %v677_v24 = vunpack.c.l.b16 %v435_v20  ;;  %v686_v6 = vunpack.c.l.b16 %v441_v3  ;;  %v689_v7 = vunpack.c.l.b16 %v443_v4  ;;  %v370_v4 = vld [vmem:[%s1946_s20 + $0x10] sm:$0xff] }
  0x5a   : > { %886 = vmatpush.bf16.msra.mxu0 %v1647_v32  ;;  %1564 = vmatmul.msk.bf16.vlgmr.msra.gmra.mxu2 %vm849_vm2, %v704_v53  ;;  %v430_v32 = vpack.c.bf16 %v390_v30, %v389_v29  ;;  %v396_v53 = vld [vmem:[%s1946_s20 + $0xe0] sm:$0xff]  ;;  %v498_v21 = vunpack.c.l.bf16 %v440_v19 }
  0x5b   : > { %935 = vmatpush.bf16.msra.mxu1 %v1655_v33  ;;  %v710_v31 = vpack.c.b16 %v677_v24, %v674_v23  ;;  %v702_v33 = vpack.c.b16 %v663_v26, %v660_v25  ;;  %541 = vperm.xlu2 %1724, %v506_v37   ;;  %v415_v23 = vld [vmem:[%s1946_s20 + $0x178] sm:$0xff]  ;;  %v401_v24 = vld [vmem:[%s1946_s20 + $0x108] sm:$0xff]  ;;  %v402_v25 = vld [vmem:[%s1946_s20 + $0x110] sm:$0xff] }
  0x5c   : > { %v493_v36 = vunpack.c.l.bf16 %v430_v32  ;;  %v669_v49 = vunpack.c.l.b16 %v430_v32  ;;  %v407_v37 = vld [vmem:[%s1946_s20 + $0x138] sm:$0xff] }
  0x5e   : > { %887 = vmatpush.bf16.msra.mxu0 %v1646_v40  ;;  %551 = vperm.xlu0 %1722, %v508_v18   ;;  %v509_v38 = vsub.f32 %v389_v29, %v493_v36  ;;  %v403_v40 = vld [vmem:[%s1946_s20 + $0x118] sm:$0xff]  ;;  %v705_v57 = vpack.c.b16 %v669_v49, %v666_v48  ;;  %v685_v48 = vunpack.c.h.b16 %v440_v19 }
  0x5f   : > { %936 = vmatpush.bf16.msra.mxu1 %v1654_v41  ;;  %v491_v41 = vunpack.c.l.bf16 %v426_v22  ;;  %v439_v43 = vpack.c.bf16 %v403_v40, %v403_v40  ;;  %v412_v22 = vld [vmem:[%s1946_s20 + $0x160] sm:$0xff] }
  0x60   : > { %556 = vperm.xlu1 %1723, %v509_v38   ;;  %v445_v26 = vpack.c.bf16 %v412_v22, %v412_v22  ;;  %v408_v38 = vld [vmem:[%s1946_s20 + $0x140] sm:$0xff] }
  0x61   : > { %v683_v45 = vunpack.c.l.b16 %v439_v43  ;;  %v507_v46 = vsub.f32 %v383_v16, %v491_v41 }
  0x62   : > { %888 = vmatpush.bf16.msra.mxu0 %v1645_v51  ;;  %v670_v51 = vunpack.c.h.b16 %v430_v32  ;;  %v692_v29 = vunpack.c.l.b16 %v445_v26 }
  0x63   : > { %937 = vmatpush.bf16.msra.mxu1 %v1653_v52  ;;  %v395_v52 = vld [vmem:[%s1946_s20 + $0xd8] sm:$0xff]  ;;  %546 = vperm.xlu2 %1724, %v507_v46   ;;  %v684_v46 = vunpack.c.l.b16 %v440_v19 }
  0x64   : > { %v434_v54 = vpack.c.bf16 %v396_v53, %v395_v52  ;;  %v706_v58 = vpack.c.b16 %v670_v51, %v667_v50  ;;  %v413_v50 = vld [vmem:[%s1946_s20 + $0x168] sm:$0xff]  ;;  %v414_v51 = vld [vmem:[%s1946_s20 + $0x170] sm:$0xff] }
  0x65   : > { %889 = vmatmul.bf16.vlgmr.msra.gmra.mxu0 %v696_v55  ;;  %v398_v55 = vld [vmem:[%s1946_s20 + $0xf0] sm:$0xff] }
  0x66   : > { %984 = vmatpush.bf16.msrb.mxu0 %v879_v34  ;;  %938 = vmatmul.bf16.vlgmr.msra.gmra.mxu1 %v697_v56  ;;  %v703_v34 = vpack.c.b16 %v664_v28, %v661_v27  ;;  %v399_v56 = vld [vmem:[%s1946_s20 + $0xf8] sm:$0xff]  ;;  %v495_v59 = vunpack.c.l.bf16 %v434_v54  ;;  %v675_v11 = vunpack.c.l.b16 %v434_v54  ;;  %v676_v13 = vunpack.c.h.b16 %v434_v54 }
  0x67   : > { %v436_v60 = vpack.c.bf16 %v399_v56, %v398_v55  ;;  %v447_v27 = vpack.c.bf16 %v415_v23, %v415_v23  ;;  %v514_v28 = vsub.f32 %v404_v14, %v498_v21  ;;  %v379_v14 = vld [vmem:[%s1946_s20 + $0x58] sm:$0xff] }
  0x68   : > { %v511_v61 = vsub.f32 %v395_v52, %v495_v59  ;;  %v446_v52 = vpack.c.bf16 %v414_v51, %v413_v50 }
  0x69   : > { %v496_v62 = vunpack.c.l.bf16 %v436_v60  ;;  %v695_v30 = vunpack.c.l.b16 %v447_v27  ;;  %v679_v35 = vunpack.c.h.b16 %v436_v60 }
  0x6a   : > { %985 = vmatpush.bf16.msrb.mxu0 %v1662_v39  ;;  %1565 = vmatmul.msk.bf16.gmra.mxu2 %vm849_vm2, %v707_v5  ;;  %v400_v39 = vld [vmem:[%s1946_s20 + $0x100] sm:$0xff]  ;;  %v694_v63 = vunpack.c.h.b16 %v446_v52 }
  0x6b   : > { %v437_v42 = vpack.c.bf16 %v400_v39, %v400_v39  ;;  %566 = vperm.xlu0 %1722, %v511_v61   ;;  %v512_v5 = vsub.f32 %v398_v55, %v496_v62  ;;  %v719_v32 = vpack.c.b16 %v695_v30, %v692_v29  ;;  %v442_v39 = vpack.c.bf16 %v408_v38, %v407_v37 }
  0x6c   : > { %v501_v55 = vunpack.c.l.bf16 %v446_v52  ;;  %v693_v61 = vunpack.c.l.b16 %v446_v52 }
  0x6d   : > { %571 = vperm.xlu1 %1723, %v512_v5   ;;  %v688_v49 = vunpack.c.h.b16 %v442_v39  ;;  %v373_v5 = vld [vmem:[%s1946_s20 + $0x28] sm:$0xff] }
  0x6e   : > { %986 = vmatpush.bf16.msrb.mxu0 %v1661_v44  ;;  %v680_v44 = vunpack.c.l.b16 %v437_v42  ;;  %v499_v42 = vunpack.c.l.bf16 %v442_v39  ;;  %v517_v56 = vsub.f32 %v413_v50, %v501_v55 }
  0x6f   : > { %v715_v54 = vpack.c.b16 %v688_v49, %v685_v48 }
  0x70   : > { %v713_v47 = vpack.c.b16 %v683_v45, %v680_v44  ;;  %v515_v43 = vsub.f32 %v407_v37, %v499_v42 }
  0x72   : > { %1567 = vmatmul.msk.bf16.vlgmr.msra.gmra.mxu3 %vm849_vm2, %v713_v47  ;;  %v687_v47 = vunpack.c.l.b16 %v442_v39 }
  0x73   : > { %581 = vperm.xlu0 %1722, %v514_v28  }
  0x74   : > { %v714_v53 = vpack.c.b16 %v687_v47, %v684_v46 }
  0x75   : > { %894 = vmatmul.bf16.gmra.mxu0 %v699_v8  ;;  %v432_v8 = vpack.c.bf16 %v393_v2, %v392_v1  ;;  %586 = vperm.xlu1 %1723, %v515_v43  }
  0x76   : > { %943 = vmatmul.bf16.gmra.mxu1 %v700_v9  ;;  %v716_v9 = vpack.c.b16 %v689_v7, %v686_v6  ;;  %v417_v6 = vpack.c.bf16 %v370_v4, %v370_v4  ;;  %v419_v7 = vpack.c.bf16 %v373_v5, %v373_v5 }
  0x77   : > { %v672_v10 = vunpack.c.l.b16 %v432_v8  ;;  %v673_v12 = vunpack.c.h.b16 %v432_v8  ;;  %v494_v18 = vunpack.c.l.bf16 %v432_v8 }
  0x78   : > { %v650_v8 = vunpack.c.l.b16 %v417_v6 }
  0x79   : > { %v708_v16 = vpack.c.b16 %v675_v11, %v672_v10  ;;  %v709_v17 = vpack.c.b16 %v676_v13, %v673_v12  ;;  %v510_v20 = vsub.f32 %v392_v1, %v494_v18  ;;  %v376_v13 = vld [vmem:[%s1946_s20 + $0x40] sm:$0xff] }
  0x7a   : > { %1566 = vmatmul.msk.bf16.gmra.mxu2 %vm849_vm2, %v710_v31  ;;  %v438_v31 = vpack.c.bf16 %v402_v25, %v401_v24  ;;  %v421_v15 = vpack.c.bf16 %v376_v13, %v376_v13 }
  0x7b   : > { %561 = vperm.xlu2 %1724, %v510_v20   ;;  %596 = vperm.xlu0 %1722, %v517_v56  }
  0x7c   : > { %v682_v36 = vunpack.c.h.b16 %v438_v31  ;;  %v497_v44 = vunpack.c.l.bf16 %v438_v31  ;;  %v656_v19 = vunpack.c.l.b16 %v421_v15 }
  0x7e   : > { %v712_v41 = vpack.c.b16 %v682_v36, %v679_v35  ;;  %v513_v45 = vsub.f32 %v401_v24, %v497_v44  ;;  %v448_v24 = vld [vmem:[%s2257_s1] sm:$0xf] }
  0x7f   : > { %v518_v26 = vunpack.c.l.bf16 %v448_v24 }
  0x82   : > { %1568 = vmatmul.msk.bf16.gmra.mxu3 %vm849_vm2, %v716_v9  ;;  %v653_v9 = vunpack.c.l.b16 %v419_v7 }
  0x83   : > { %576 = vperm.xlu2 %1724, %v513_v45   ;;  %v2110_v45 = vld [vmem:[%s2258_s2] ss:$0 sm:$0xff] }
  0x84   : > { %v698_v10 = vpack.c.b16 %v653_v9, %v650_v8 }
  0x85   : > { %899 = vmatmul.bf16.gmra.mxu0 %v702_v33  ;;  %v678_v33 = vunpack.c.l.b16 %v436_v60 }
  0x86   : > { %948 = vmatmul.bf16.gmra.mxu1 %v703_v34  ;;  %v681_v34 = vunpack.c.l.b16 %v438_v31  ;;  %v2099_v31 = vperm.slane %v518_v26, 0 }
  0x88   : > { %v711_v40 = vpack.c.b16 %v681_v34, %v678_v33 }
  0x92   : > { %1569 = vmatmul.msk.bf16.gmra.mxu3 %vm849_vm2, %v719_v32 }
  0x95   : > { %904 = vmatmul.bf16.gmra.mxu0 %v705_v57  ;;  %v410_v57 = vld [vmem:[%s1946_s20 + $0x150] sm:$0xff] }
  0x96   : > { %953 = vmatmul.bf16.gmra.mxu1 %v706_v58  ;;  %v411_v58 = vld [vmem:[%s1946_s20 + $0x158] sm:$0xff] }
  0x97   : > { %v444_v59 = vpack.c.bf16 %v411_v58, %v410_v57 }
  0x99   : > { %v690_v60 = vunpack.c.l.b16 %v444_v59  ;;  %v691_v62 = vunpack.c.h.b16 %v444_v59  ;;  %v500_v2 = vunpack.c.l.bf16 %v444_v59 }
  0x9b   : > { %v717_v0 = vpack.c.b16 %v693_v61, %v690_v60  ;;  %v718_v1 = vpack.c.b16 %v694_v63, %v691_v62  ;;  %v516_v3 = vsub.f32 %v410_v57, %v500_v2 }
  0x9d   : > { %591 = vperm.xlu2 %1724, %v516_v3  }
  0xa5   : > { %909 = vmatmul.bf16.gmra.mxu0 %v708_v16  ;;  %v423_v16 = vpack.c.bf16 %v379_v14, %v379_v14 }
  0xa6   : > { %958 = vmatmul.bf16.gmra.mxu1 %v709_v17 }
  0xa7   : > { %v659_v20 = vunpack.c.l.b16 %v423_v16 }
  0xa9   : > { %v701_v21 = vpack.c.b16 %v659_v20, %v656_v19 }
  0xb5   : > { %914 = vmatmul.bf16.gmra.mxu0 %v711_v40  ;;  %v542_v27 = vpop.permute.xlu2 %541 }
  0xb6   : > { %963 = vmatmul.bf16.gmra.mxu1 %v712_v41  ;;  %v604_v32 = vmul.f32 %v2099_v31, %v542_v27 }
  0xbd   : > { %v547_v39 = vpop.permute.xlu2 %546 }
  0xbe   : > { %v605_v41 = vmul.f32 %v2099_v31, %v547_v39 }
  0xc0   : > { %v2093_v25 = vpop.permute.xlu0 %521 }
  0xc2   : > { %v2102_v33 = vpop.permute.xlu1 %531 }
  0xc5   : > { %919 = vmatmul.bf16.gmra.mxu0 %v714_v53 }
  0xc6   : > { %968 = vmatmul.bf16.gmra.mxu1 %v715_v54 }
  0xc8   : > { %v2104_v38 = vpop.permute.xlu0 %526 }
  0xca   : > { %v2112_v47 = vpop.permute.xlu1 %536 }
  0xd0   : > { %v552_v48 = vpop.permute.xlu0 %551 }
  0xd1   : > { %v606_v53 = vmul.f32 %v2099_v31, %v552_v48 }
  0xd2   : > { %v557_v60 = vpop.permute.xlu1 %556 }
  0xd3   : > { %v607_v63 = vmul.f32 %v2099_v31, %v557_v60 }
  0xd5   : > { %924 = vmatmul.bf16.gmra.mxu0 %v717_v0  ;;  %v562_v5 = vpop.permute.xlu2 %561 }
  0xd6   : > { %973 = vmatmul.bf16.gmra.mxu1 %v718_v1  ;;  %v608_v9 = vmul.f32 %v2099_v31, %v562_v5 }
  0xdd   : > { %v998_v28 = vpop.f32.mrf.mxu2 }
  0xdf   : > { %v572_v39 = vpop.permute.xlu1 %571 }
  0xe2   : > { %v2074_v11 = vpop.f32.mrf.mxu0 }
  0xe3   : > { %v2076_v12 = vpop.f32.mrf.mxu1 }
  0xe5   : > { %1562 = vmatmul.msk.bf16.vlgmr.msrb.gmra.mxu0 %vm849_vm2, %v698_v10  ;;  %v1000_v37 = vpop.f32.mrf.mxu2 }
  0xea   : > { %v2081_v17 = vpop.f32.mrf.mxu0 }
  0xeb   : > { %v2083_v18 = vpop.f32.mrf.mxu1 }
  0xed   : > { %v1003_v50 = vpop.f32.mrf.mxu2 }
  0xf2   : > { %v2085_v22 = vpop.f32.mrf.mxu0 }
  0xf3   : > { %v2087_v23 = vpop.f32.mrf.mxu1 }
  0xf5   : > { %1563 = vmatmul.msk.bf16.gmra.mxu0 %vm849_vm2, %v701_v21  ;;  %v1005_v0 = vpop.f32.mrf.mxu2  ;;  %v567_v21 = vpop.permute.xlu0 %566 }
  0xf6   : > { %v609_v27 = vmul.f32 %v2099_v31, %v567_v21 }
  0xfa   : > { %v2095_v29 = vpop.f32.mrf.mxu0 }
  0xfb   : > { %v2097_v30 = vpop.f32.mrf.mxu1 }
  0xfd   : > { %v1008_v13 = vpop.f32.mrf.mxu2 }
 0x102   : > { %v900_v34 = vpop.f32.mrf.mxu0 }
 0x103   : > { %v949_v35 = vpop.f32.mrf.mxu1  ;;  %v901_v36 = vadd.f32 %v900_v34, %v604_v32 }
 0x105   : > { %v950_v40 = vadd.f32 %v949_v35, %v901_v36 }
 0x107   : > { %v999_v44 = vadd.f32 %v998_v28, %v950_v40  ;;  %v1013_v28 = vpop.f32.mrf.mxu3 }
 0x109   : > { %v1036_v51 = vadd.f32 %v2110_v45, %v999_v44 }
 0x10a   : > { %v902_v42 = vpop.f32.mrf.mxu0 }
 0x10b   : > { %v951_v43 = vpop.f32.mrf.mxu1  ;;  %v903_v46 = vadd.f32 %v902_v42, %v605_v41  ;;  %v1052_v57 = vmax.f32 %v1036_v51, 0.0 }
 0x10d   : > { %v952_v49 = vadd.f32 %v951_v43, %v903_v46  ;;  %v610_v43 = vmul.f32 %v2099_v31, %v572_v39 }
 0x10f   : > { %v1001_v52 = vadd.f32 %v1000_v37, %v952_v49  ;;  %v1010_v37 = vpop.f32.mrf.mxu2 }
 0x111   : > { %v1037_v54 = vadd.f32 %v2110_v45, %v1001_v52  ;;  %v1015_v52 = vpop.f32.mrf.mxu3 }
 0x112   : > { %v905_v55 = vpop.f32.mrf.mxu0 }
 0x113   : > { %v954_v56 = vpop.f32.mrf.mxu1  ;;  %v1053_v58 = vmax.f32 %v1037_v54, 0.0  ;;  %v906_v59 = vadd.f32 %v905_v55, %v606_v53  ;;  %v577_v53 = vpop.permute.xlu2 %576 }
 0x115   : > { %v2117_v61 = vpack.c.bf16 %v1053_v58, %v1052_v57  ;;  %v955_v62 = vadd.f32 %v954_v56, %v906_v59  ;;  %v611_v56 = vmul.f32 %v2099_v31, %v577_v53 }
 0x117   : > { %v1004_v3 = vadd.f32 %v1003_v50, %v955_v62  ;;  %v582_v62 = vpop.permute.xlu0 %581 }
 0x119   : > { %v1038_v7 = vadd.f32 %v2110_v45, %v1004_v3  ;;  %v612_v3 = vmul.f32 %v2099_v31, %v582_v62 }
 0x11a   : > { %v907_v1 = vpop.f32.mrf.mxu0 }
 0x11b   : > { %v956_v2 = vpop.f32.mrf.mxu1  ;;  %v908_v4 = vadd.f32 %v907_v1, %v607_v63  ;;  %v1054_v16 = vmax.f32 %v1038_v7, 0.0  ;;  %v1667_v7 = vld [vmem:[%s2259_s3 + $0x18] sm:$0xff] }
 0x11c   : > { %1137 = vmatpush.bf16.msrb.mxu3 %v1667_v7 }
 0x11d   : > { %v957_v6 = vadd.f32 %v956_v2, %v908_v4 }
 0x11f   : > { %v1006_v8 = vadd.f32 %v1005_v0, %v957_v6  ;;  %v1018_v0 = vpop.f32.mrf.mxu3 }
 0x121   : > { %v1039_v10 = vadd.f32 %v2110_v45, %v1006_v8 }
 0x122   : > { %v910_v14 = vpop.f32.mrf.mxu0 }
 0x123   : > { %v959_v15 = vpop.f32.mrf.mxu1  ;;  %v1055_v19 = vmax.f32 %v1039_v10, 0.0  ;;  %v911_v20 = vadd.f32 %v910_v14, %v608_v9 }
 0x125   : > { %v2123_v24 = vpack.c.bf16 %v1055_v19, %v1054_v16  ;;  %v960_v26 = vadd.f32 %v959_v15, %v911_v20  ;;  %v1666_v15 = vld [vmem:[%s2259_s3 + $0x10] sm:$0xff] }
 0x126   : > { %1138 = vmatpush.bf16.msrb.mxu3 %v1666_v15 }
 0x127   : > { %v1009_v35 = vadd.f32 %v1008_v13, %v960_v26  ;;  %v587_v13 = vpop.permute.xlu1 %586  ;;  %v1020_v20 = vpop.f32.mrf.mxu3 }
 0x128   : > { %v613_v19 = vmul.f32 %v2099_v31, %v587_v13 }
 0x129   : > { %v1040_v41 = vadd.f32 %v2110_v45, %v1009_v35 }
 0x12a   : > { %v912_v32 = vpop.f32.mrf.mxu0 }
 0x12b   : > { %v961_v34 = vpop.f32.mrf.mxu1  ;;  %v913_v36 = vadd.f32 %v912_v32, %v609_v27  ;;  %v1056_v49 = vmax.f32 %v1040_v41, 0.0  ;;  %v1665_v27 = vld [vmem:[%s2259_s3 + $0x8] sm:$0xff] }
 0x12c   : > { %1139 = vmatpush.bf16.msrb.mxu3 %v1665_v27 }
 0x12d   : > { %v962_v40 = vadd.f32 %v961_v34, %v913_v36  ;;  %v592_v34 = vpop.permute.xlu2 %591  ;;  %v1664_v36 = vld [vmem:[%s2259_s3] sm:$0xff] }
 0x12f   : > { %v1011_v42 = vadd.f32 %v1010_v37, %v962_v40  ;;  %v614_v40 = vmul.f32 %v2099_v31, %v592_v34 }
 0x130   : > { %1140 = vmatpush.bf16.msrb.mxu3 %v1664_v36 }
 0x131   : > { %v1041_v44 = vadd.f32 %v2110_v45, %v1011_v42  ;;  %v1023_v42 = vpop.f32.mrf.mxu3 }
 0x132   : > { %v915_v46 = vpop.f32.mrf.mxu0 }
 0x133   : > { %v964_v48 = vpop.f32.mrf.mxu1  ;;  %v1057_v50 = vmax.f32 %v1041_v44, 0.0  ;;  %v916_v51 = vadd.f32 %v915_v46, %v610_v43 }
 0x135   : > { %v2129_v54 = vpack.c.bf16 %v1057_v50, %v1056_v49  ;;  %v965_v55 = vadd.f32 %v964_v48, %v916_v51  ;;  %v597_v50 = vpop.permute.xlu0 %596 }
 0x136   : > { %v615_v53 = vmul.f32 %v2099_v31, %v597_v50 }
 0x137   : > { %v1014_v59 = vadd.f32 %v1013_v28, %v965_v55 }
 0x139   : > { %v1042_v1 = vadd.f32 %v2110_v45, %v1014_v59  ;;  %v1025_v59 = vpop.f32.mrf.mxu3 }
 0x13a   : > { %v917_v57 = vpop.f32.mrf.mxu0 }
 0x13b   : > { %v966_v58 = vpop.f32.mrf.mxu1  ;;  %v918_v60 = vadd.f32 %v917_v57, %v611_v56  ;;  %v1058_v8 = vmax.f32 %v1042_v1, 0.0 }
 0x13d   : > { %v967_v63 = vadd.f32 %v966_v58, %v918_v60  ;;  %v600_v60 = vmul.f32 %v2099_v31, %v2093_v25 }
 0x13f   : > { %v1016_v2 = vadd.f32 %v1015_v52, %v967_v63  ;;  %v891_v1 = vadd.f32 %v2074_v11, %v600_v60 }
 0x141   : > { %v1043_v4 = vadd.f32 %v2110_v45, %v1016_v2  ;;  %v601_v2 = vmul.f32 %v2099_v31, %v2104_v38  ;;  %v940_v7 = vadd.f32 %v2076_v12, %v891_v1  ;;  %v602_v38 = vmul.f32 %v2099_v31, %v2102_v33 }
 0x142   : > { %v920_v5 = vpop.f32.mrf.mxu0 }
 0x143   : > { %v969_v6 = vpop.f32.mrf.mxu1  ;;  %v1059_v9 = vmax.f32 %v1043_v4, 0.0  ;;  %v921_v10 = vadd.f32 %v920_v5, %v612_v3  ;;  %v896_v12 = vadd.f32 %v2085_v22, %v602_v38 }
 0x145   : > { %v2138_v14 = vpack.c.bf16 %v1059_v9, %v1058_v8  ;;  %v970_v16 = vadd.f32 %v969_v6, %v921_v10  ;;  %v893_v8 = vadd.f32 %v2081_v17, %v601_v2  ;;  %v603_v17 = vmul.f32 %v2099_v31, %v2112_v47  ;;  %v1671_v47 = vld [vmem:[%s2261_s5 + $0x18] sm:$0xff] }
 0x147   : > { %v1019_v28 = vadd.f32 %v1018_v0, %v970_v16  ;;  %v942_v10 = vadd.f32 %v2083_v18, %v893_v8  ;;  %v945_v18 = vadd.f32 %v2087_v23, %v896_v12  ;;  %v898_v27 = vadd.f32 %v2095_v29, %v603_v17  ;;  %v1675_v23 = vld [vmem:[%s2261_s5 + $0x38] sm:$0xff]  ;;  %v1674_v29 = vld [vmem:[%s2261_s5 + $0x30] sm:$0xff] }
 0x148   : > { %1274 = vmatpush.bf16.msrb.mxu2 %v1675_v23 }
 0x149   : > { %v1044_v37 = vadd.f32 %v2110_v45, %v1019_v28  ;;  %v947_v33 = vadd.f32 %v2097_v30, %v898_v27  ;;  %v1673_v30 = vld [vmem:[%s2261_s5 + $0x28] sm:$0xff] }
 0x14a   : > { %v922_v21 = vpop.f32.mrf.mxu0 }
 0x14b   : > { %v971_v26 = vpop.f32.mrf.mxu1  ;;  %v923_v32 = vadd.f32 %v922_v21, %v613_v19  ;;  %v1060_v46 = vmax.f32 %v1044_v37, 0.0 }
 0x14c   : > { %1275 = vmatpush.bf16.msrb.mxu2 %v1674_v29 }
 0x14d   : > { %v972_v35 = vadd.f32 %v971_v26, %v923_v32 }
 0x14f   : > { %v1021_v39 = vadd.f32 %v1020_v20, %v972_v35 }
 0x150   : > { %1276 = vmatpush.bf16.msrb.mxu2 %v1673_v30 }
 0x151   : > { %v1045_v41 = vadd.f32 %v2110_v45, %v1021_v39  ;;  %v1726_v39 = vld [vmem:[%s2260_s4] ss:$0 sm:$0xff] }
 0x152   : > { %v925_v43 = vpop.f32.mrf.mxu0 }
 0x153   : > { %v974_v44 = vpop.f32.mrf.mxu1  ;;  %v1061_v48 = vmax.f32 %v1045_v41, 0.0  ;;  %v926_v49 = vadd.f32 %v925_v43, %v614_v40 }
 0x155   : > { %v1070_v51 = vpack.c.bf16 %v1061_v48, %v1060_v46  ;;  %v975_v52 = vadd.f32 %v974_v44, %v926_v49 }
 0x157   : > { %v1024_v57 = vadd.f32 %v1023_v42, %v975_v52 }
 0x159   : > { %v1046_v63 = vadd.f32 %v2110_v45, %v1024_v57 }
 0x15a   : > { %v927_v55 = vpop.f32.mrf.mxu0 }
 0x15b   : > { %v976_v56 = vpop.f32.mrf.mxu1  ;;  %v928_v58 = vadd.f32 %v927_v55, %v615_v53  ;;  %v1062_v5 = vmax.f32 %v1046_v63, 0.0 }
 0x15d   : > { %v977_v62 = vadd.f32 %v976_v56, %v928_v58 }
 0x15f   : > { %v1026_v0 = vadd.f32 %v1025_v59, %v977_v62 }
 0x161   : > { %v1047_v3 = vadd.f32 %v2110_v45, %v1026_v0 }
 0x162   : > { %v988_v4 = vpop.f32.mrf.mxu0 }
 0x163   : > { %v1063_v6 = vmax.f32 %v1047_v3, 0.0  ;;  %v989_v25 = vadd.f32 %v988_v4, %v940_v7 }
 0x165   : > { %v1071_v9 = vpack.c.bf16 %v1063_v6, %v1062_v5  ;;  %v1032_v15 = vadd.f32 %v2110_v45, %v989_v25 }
 0x167   : > { %v1048_v19 = vmax.f32 %v1032_v15, 0.0 }
 0x16a   : > { %v990_v13 = vpop.f32.mrf.mxu0 }
 0x16b   : > { %v991_v11 = vadd.f32 %v990_v13, %v942_v10 }
 0x16d   : > { %v1033_v16 = vadd.f32 %v2110_v45, %v991_v11 }
 0x16f   : > { %v1049_v20 = vmax.f32 %v1033_v16, 0.0 }
 0x171   : > { %v1064_v21 = vpack.c.bf16 %v1049_v20, %v1048_v19 }
 0x172   : > { %v993_v26 = vpop.f32.mrf.mxu0 }
 0x173   : > { %1586 = vmatmul.msk.bf16.vlgmr.msrb.gmra.mxu3 %vm1108_vm3, %v1064_v21  ;;  %v994_v28 = vadd.f32 %v993_v26, %v945_v18 }
 0x175   : > { %v1034_v34 = vadd.f32 %v2110_v45, %v994_v28 }
 0x177   : > { %v1050_v36 = vmax.f32 %v1034_v34, 0.0 }
 0x17a   : > { %v995_v32 = vpop.f32.mrf.mxu0 }
 0x17b   : > { %v996_v35 = vadd.f32 %v995_v32, %v947_v33 }
 0x17d   : > { %v1035_v22 = vadd.f32 %v2110_v45, %v996_v35  ;;  %v1672_v45 = vld [vmem:[%s2261_s5 + $0x20] sm:$0xff] }
 0x17e   : > { %1277 = vmatpush.bf16.msrb.mxu2 %v1672_v45 }
 0x17f   : > { %v1051_v37 = vmax.f32 %v1035_v22, 0.0 }
 0x181   : > { %v1065_v31 = vpack.c.bf16 %v1051_v37, %v1050_v36 }
 0x182   : > { %1278 = vmatpush.bf16.msrb.mxu2 %v1671_v47 }
 0x183   : > { %1587 = vmatmul.msk.bf16.gmra.mxu3 %vm1108_vm3, %v1065_v31 }
 0x193   : > { %1588 = vmatmul.msk.bf16.gmra.mxu3 %vm1108_vm3, %v2117_v61  ;;  %v1670_v61 = vld [vmem:[%s2261_s5 + $0x10] sm:$0xff] }
 0x194   : > { %1279 = vmatpush.bf16.msrb.mxu2 %v1670_v61 }
 0x1a3   : > { %1589 = vmatmul.msk.bf16.gmra.mxu3 %vm1108_vm3, %v2123_v24  ;;  %v1669_v24 = vld [vmem:[%s2261_s5 + $0x8] sm:$0xff] }
 0x1a4   : > { %1280 = vmatpush.bf16.msrb.mxu2 %v1669_v24 }
 0x1b3   : > { %1590 = vmatmul.msk.bf16.gmra.mxu3 %vm1108_vm3, %v2129_v54  ;;  %v1668_v54 = vld [vmem:[%s2261_s5] sm:$0xff] }
 0x1b4   : > { %1281 = vmatpush.bf16.msrb.mxu2 %v1668_v54 }
 0x1c3   : > { %1591 = vmatmul.msk.bf16.gmra.mxu3 %vm1108_vm3, %v2138_v14 }
 0x1d3   : > { %1592 = vmatmul.msk.bf16.gmra.mxu3 %vm1108_vm3, %v1070_v51 }
 0x1e3   : > { %1593 = vmatmul.msk.bf16.gmra.mxu3 %vm1108_vm3, %v1071_v9 }
 0x1f6   : > { %v1142_v14 = vpop.f32.mrf.mxu3 }
 0x1f7   : > { %v1143_v40 = vadd.f32 %v1726_v39, %v1142_v14 }
 0x1f9   : > { %v1182_v43 = vmax.f32 %v1143_v40, 0.0 }
 0x1fe   : > { %v1144_v41 = vpop.f32.mrf.mxu3 }
 0x1ff   : > { %v1145_v42 = vadd.f32 %v1726_v39, %v1144_v41 }
 0x201   : > { %v1183_v44 = vmax.f32 %v1145_v42, 0.0 }
 0x203   : > { %v1198_v46 = vpack.c.bf16 %v1183_v44, %v1182_v43 }
 0x205   : > { %1282 = vmatmul.bf16.vlgmr.msrb.gmra.mxu2 %v1198_v46 }
 0x206   : > { %v1147_v48 = vpop.f32.mrf.mxu3 }
 0x207   : > { %v1148_v49 = vadd.f32 %v1726_v39, %v1147_v48 }
 0x209   : > { %v1184_v52 = vmax.f32 %v1148_v49, 0.0 }
 0x20e   : > { %v1149_v50 = vpop.f32.mrf.mxu3 }
 0x20f   : > { %v1150_v51 = vadd.f32 %v1726_v39, %v1149_v50 }
 0x211   : > { %v1185_v53 = vmax.f32 %v1150_v51, 0.0 }
 0x213   : > { %v1199_v55 = vpack.c.bf16 %v1185_v53, %v1184_v52 }
 0x215   : > { %1287 = vmatmul.bf16.gmra.mxu2 %v1199_v55 }
 0x216   : > { %v1152_v56 = vpop.f32.mrf.mxu3 }
 0x217   : > { %v1153_v57 = vadd.f32 %v1726_v39, %v1152_v56 }
 0x219   : > { %v1186_v60 = vmax.f32 %v1153_v57, 0.0 }
 0x21e   : > { %v1154_v58 = vpop.f32.mrf.mxu3 }
 0x21f   : > { %v1155_v59 = vadd.f32 %v1726_v39, %v1154_v58 }
 0x221   : > { %v1187_v62 = vmax.f32 %v1155_v59, 0.0 }
 0x223   : > { %v1200_v63 = vpack.c.bf16 %v1187_v62, %v1186_v60 }
 0x225   : > { %1292 = vmatmul.bf16.gmra.mxu2 %v1200_v63 }
 0x226   : > { %v1157_v0 = vpop.f32.mrf.mxu3 }
 0x227   : > { %v1158_v1 = vadd.f32 %v1726_v39, %v1157_v0 }
 0x229   : > { %v1188_v4 = vmax.f32 %v1158_v1, 0.0 }
 0x22e   : > { %v1159_v2 = vpop.f32.mrf.mxu3 }
 0x22f   : > { %v1160_v3 = vadd.f32 %v1726_v39, %v1159_v2 }
 0x231   : > { %v1189_v5 = vmax.f32 %v1160_v3, 0.0 }
 0x233   : > { %v1201_v6 = vpack.c.bf16 %v1189_v5, %v1188_v4 }
 0x235   : > { %1297 = vmatmul.bf16.gmra.mxu2 %v1201_v6 }
 0x236   : > { %v1162_v7 = vpop.f32.mrf.mxu3 }
 0x237   : > { %v1163_v8 = vadd.f32 %v1726_v39, %v1162_v7 }
 0x239   : > { %v1190_v10 = vmax.f32 %v1163_v8, 0.0 }
 0x23e   : > { %v1164_v9 = vpop.f32.mrf.mxu3 }
 0x23f   : > { %v1165_v25 = vadd.f32 %v1726_v39, %v1164_v9 }
 0x241   : > { %v1191_v13 = vmax.f32 %v1165_v25, 0.0 }
 0x243   : > { %v1202_v15 = vpack.c.bf16 %v1191_v13, %v1190_v10 }
 0x245   : > { %1302 = vmatmul.bf16.gmra.mxu2 %v1202_v15 }
 0x246   : > { %v1167_v11 = vpop.f32.mrf.mxu3 }
 0x247   : > { %v1168_v38 = vadd.f32 %v1726_v39, %v1167_v11 }
 0x249   : > { %v1192_v20 = vmax.f32 %v1168_v38, 0.0 }
 0x24e   : > { %v1169_v16 = vpop.f32.mrf.mxu3 }
 0x24f   : > { %v1170_v19 = vadd.f32 %v1726_v39, %v1169_v16 }
 0x251   : > { %v1193_v12 = vmax.f32 %v1170_v19, 0.0 }
 0x253   : > { %v1203_v17 = vpack.c.bf16 %v1193_v12, %v1192_v20 }
 0x255   : > { %1307 = vmatmul.bf16.gmra.mxu2 %v1203_v17  ;;  %v1339_v17 = vld [vmem:[%s2263_s7] sm:$0xff] }
 0x256   : > { %v1172_v21 = vpop.f32.mrf.mxu3 }
 0x257   : > { %v1173_v26 = vadd.f32 %v1726_v39, %v1172_v21  ;;  %v1413_v21 = vstv %s1412_s25 }
 0x259   : > { %v1194_v28 = vmax.f32 %v1173_v26, 0.0 }
 0x25e   : > { %v1174_v18 = vpop.f32.mrf.mxu3 }
 0x25f   : > { %v1175_v27 = vadd.f32 %v1726_v39, %v1174_v18 }
 0x261   : > { %v1195_v33 = vmax.f32 %v1175_v27, 0.0 }
 0x263   : > { %v1204_v32 = vpack.c.bf16 %v1195_v33, %v1194_v28 }
 0x265   : > { %1312 = vmatmul.bf16.gmra.mxu2 %v1204_v32 }
 0x266   : > { %v1177_v34 = vpop.f32.mrf.mxu3 }
 0x267   : > { %v1178_v35 = vadd.f32 %v1726_v39, %v1177_v34 }
 0x269   : > { %v1196_v37 = vmax.f32 %v1178_v35, 0.0 }
 0x26e   : > { %v1179_v22 = vpop.f32.mrf.mxu3 }
 0x26f   : > { %v1180_v36 = vadd.f32 %v1726_v39, %v1179_v22  ;;  %v1727_v39 = vld [vmem:[%s2262_s6] ss:$0 sm:$0xff] }
 0x271   : > { %v1197_v31 = vmax.f32 %v1180_v36, 0.0 }
 0x273   : > { %v1205_v23 = vpack.c.bf16 %v1197_v31, %v1196_v37 }
 0x275   : > { %1317 = vmatmul.bf16.gmra.mxu2 %v1205_v23 }
 0x288   : > { %v1283_v29 = vpop.f32.mrf.mxu2 }
 0x289   : > { %v1284_v19 = vadd.f32 %v1727_v39, %v1283_v29 }
 0x28b   : > { %v1323_v12 = vmax.f32 %v1284_v19, 0.0 }
 0x290   : > { %v1285_v30 = vpop.f32.mrf.mxu2 }
 0x291   : > { %v1286_v38 = vadd.f32 %v1727_v39, %v1285_v30 }
 0x293   : > { %v1324_v20 = vmax.f32 %v1286_v38, 0.0 }
 0x298   : > { %v1288_v45 = vpop.f32.mrf.mxu2 }
 0x299   : > { %v1289_v15 = vadd.f32 %v1727_v39, %v1288_v45 }
 0x29b   : > { %v1325_v16 = vmax.f32 %v1289_v15, 0.0 }
 0x2a0   : > { %v1290_v47 = vpop.f32.mrf.mxu2 }
 0x2a1   : > { %v1291_v10 = vadd.f32 %v1727_v39, %v1290_v47 }
 0x2a3   : > { %v1326_v11 = vmax.f32 %v1291_v10, 0.0 }
 0x2a8   : > { %v1293_v61 = vpop.f32.mrf.mxu2 }
 0x2a9   : > { %v1294_v9 = vadd.f32 %v1727_v39, %v1293_v61 }
 0x2ab   : > { %v1327_v13 = vmax.f32 %v1294_v9, 0.0 }
 0x2b0   : > { %v1295_v24 = vpop.f32.mrf.mxu2 }
 0x2b1   : > { %v1296_v7 = vadd.f32 %v1727_v39, %v1295_v24 }
 0x2b3   : > { %v1328_v25 = vmax.f32 %v1296_v7, 0.0 }
 0x2b8   : > { %v1298_v54 = vpop.f32.mrf.mxu2 }
 0x2b9   : > { %v1299_v5 = vadd.f32 %v1727_v39, %v1298_v54 }
 0x2bb   : > { %v1329_v8 = vmax.f32 %v1299_v5, 0.0 }
 0x2c0   : > { %v1300_v14 = vpop.f32.mrf.mxu2 }
 0x2c1   : > { %v1301_v3 = vadd.f32 %v1727_v39, %v1300_v14 }
 0x2c3   : > { %v1330_v6 = vmax.f32 %v1301_v3, 0.0 }
 0x2c8   : > { %v1303_v40 = vpop.f32.mrf.mxu2 }
 0x2c9   : > { %v1304_v1 = vadd.f32 %v1727_v39, %v1303_v40 }
 0x2cb   : > { %v1331_v4 = vmax.f32 %v1304_v1, 0.0 }
 0x2d0   : > { %v1305_v41 = vpop.f32.mrf.mxu2 }
 0x2d1   : > { %v1306_v63 = vadd.f32 %v1727_v39, %v1305_v41 }
 0x2d3   : > { %v1332_v2 = vmax.f32 %v1306_v63, 0.0 }
 0x2d8   : > { %v1308_v42 = vpop.f32.mrf.mxu2 }
 0x2d9   : > { %v1309_v60 = vadd.f32 %v1727_v39, %v1308_v42 }
 0x2db   : > { %v1333_v0 = vmax.f32 %v1309_v60, 0.0 }
 0x2e0   : > { %v1310_v43 = vpop.f32.mrf.mxu2 }
 0x2e1   : > { %v1311_v58 = vadd.f32 %v1727_v39, %v1310_v43 }
 0x2e3   : > { %v1334_v62 = vmax.f32 %v1311_v58, 0.0 }
 0x2e8   : > { %v1313_v44 = vpop.f32.mrf.mxu2 }
 0x2e9   : > { %v1314_v56 = vadd.f32 %v1727_v39, %v1313_v44 }
 0x2eb   : > { %v1335_v59 = vmax.f32 %v1314_v56, 0.0 }
 0x2f0   : > { %v1315_v46 = vpop.f32.mrf.mxu2 }
 0x2f1   : > { %v1316_v53 = vadd.f32 %v1727_v39, %v1315_v46 }
 0x2f3   : > { %v1336_v57 = vmax.f32 %v1316_v53, 0.0 }
 0x2f8   : > { %v1318_v48 = vpop.f32.mrf.mxu2 }
 0x2f9   : > { %v1319_v51 = vadd.f32 %v1727_v39, %v1318_v48 }
 0x2fb   : > { %v1337_v55 = vmax.f32 %v1319_v51, 0.0 }
 0x300   : > { %v1320_v49 = vpop.f32.mrf.mxu2 }
 0x301   : > { %v1321_v50 = vadd.f32 %v1727_v39, %v1320_v49 }
 0x303   : > { %v1338_v52 = vmax.f32 %v1321_v50, 0.0 }
 0x305   : > { %1626 = vmatpush.xpose.msk.msrb.mxu1 %vm1340_vm4, %v1338_v52 }
 0x309   : > { %1627 = vmatpush.xpose.msk.msrb.mxu1 %vm1340_vm4, %v1337_v55 }
 0x30d   : > { %1628 = vmatpush.xpose.msk.msrb.mxu1 %vm1340_vm4, %v1336_v57 }
 0x311   : > { %1629 = vmatpush.xpose.msk.msrb.mxu1 %vm1340_vm4, %v1335_v59 }
 0x315   : > { %1630 = vmatpush.xpose.msk.msrb.mxu1 %vm1340_vm4, %v1334_v62 }
 0x319   : > { %1631 = vmatpush.xpose.msk.msrb.mxu1 %vm1340_vm4, %v1333_v0 }
 0x31d   : > { %1632 = vmatpush.xpose.msk.msrb.mxu1 %vm1340_vm4, %v1332_v2 }
 0x321   : > { %1633 = vmatpush.xpose.msk.msrb.mxu1 %vm1340_vm4, %v1331_v4 }
 0x325   : > { %1634 = vmatpush.xpose.msk.msrb.mxu1 %vm1340_vm4, %v1330_v6 }
 0x329   : > { %1635 = vmatpush.xpose.msk.msrb.mxu1 %vm1340_vm4, %v1329_v8 }
 0x32d   : > { %1636 = vmatpush.xpose.msk.msrb.mxu1 %vm1340_vm4, %v1328_v25 }
 0x331   : > { %1637 = vmatpush.xpose.msk.msrb.mxu1 %vm1340_vm4, %v1327_v13 }
 0x335   : > { %1638 = vmatpush.xpose.msk.msrb.mxu1 %vm1340_vm4, %v1326_v11 }
 0x339   : > { %1639 = vmatpush.xpose.msk.msrb.mxu1 %vm1340_vm4, %v1325_v16 }
 0x33d   : > { %1640 = vmatpush.xpose.msk.msrb.mxu1 %vm1340_vm4, %v1324_v20 }
 0x341   : > { %1641 = vmatpush.xpose.msk.msrb.mxu1 %vm1340_vm4, %v1323_v12 }
 0x344   : > { %1642 = vmatmul.msk.f32.vlgmr.msrb.gmra.mxu1 %vm1340_vm4, %v1339_v17 }
 0x3c1   : > { %v1409_v26 = vpop.f32.mrf.mxu1 }
 0x3c2   : > { %v1414_v18 = vadd.f32 %v1413_v21, %v1409_v26 }
 0x3c4   : > { %1415 = vst [vmem:[%s366_s16] sm:$0x1] %v1414_v18 }
 0x3c5 PF: > { %p20_p9 = scmp.ge.s32.totalorder %s1883_s15, 5   ;;  %s2268_s11 = smov %s1793_s12 }
 0x3c6   : > { %s2269_s12 = smov %s1797_s13  ;;  %s2270_s13 = smov %s1893_s18 }
 0x3c7   : > { %s2271_s14 = smov %s1883_s15  ;;  %22 = sbr.rel (!%p20_p9) target bundleno = 5 (0x5), region = 96 }
 0x3cc   :  { %1433 = vsyncpa [#allocation4], 1 }
 0x3cd   :  { %1435 = vsyncpa [#allocation4 + $0x1], 1 }

</bundles_post_ra>
